<compile_context>
chip_gen: v7x
topology: tpu7x:2x2x1
jax: 0.10.0
libtpu: 0.0.40
codegen_flags: <defaults>
</compile_context>

<pallas_src>
import jax
import jax.numpy as jnp
from jax.experimental import pallas as pl
from jax.experimental.pallas import tpu as pltpu


def _round_up(x, m):
    return (x + m - 1) // m * m


def _dot_prod_attn_kernel(enc_ref, hid_ref, combo_ref, energy_ref, acc_ref):
    # enc_ref   : (BB, tT, D)   encoder tile (keys == values)
    # hid_ref   : (BB, D)       queries
    # combo_ref : (BB, D)       lane-dense output slab
    # energy_ref: (BB, tT)      lane-dense output slab
    # acc_ref   : (BB, D) f32   combo accumulator across the T grid axis
    t = pl.program_id(1)

    enc = enc_ref[...].astype(jnp.float32)               # (BB, tT, D)
    hid = hid_ref[...].astype(jnp.float32)                # (BB, D)

    # energy[b, t] = sum_d hid[b, d] * enc[b, t, d]   (VPU mul + lane reduce)
    energy = jnp.sum(enc * hid[:, None, :], axis=-1)       # (BB, tT)
    energy_ref[...] = energy.astype(energy_ref.dtype)

    # combo[b, d] = sum_t energy[b, t] * enc[b, t, d] (VPU mul + sublane reduce)
    partial = jnp.sum(enc * energy[:, :, None], axis=1)    # (BB, D)

    @pl.when(t == 0)
    def _():
        acc_ref[...] = jnp.zeros_like(acc_ref)

    acc_ref[...] += partial

    @pl.when(t == pl.num_programs(1) - 1)
    def _():
        combo_ref[...] = acc_ref[...].astype(combo_ref.dtype)


def _choose_blocks(B, T, D, itemsize):
    """Pick (BB, tT) so one encoder tile stays within a conservative VMEM budget
    (double-buffered tile + f32 intermediates stay well under v7x's 64 MiB)."""
    tile_budget = 6 * 1024 * 1024            # bytes per encoder tile buffer
    b_pad8 = _round_up(B, 8)
    row_bytes = T * D * itemsize             # one batch row of the encoder tile
    if 8 * row_bytes <= tile_budget:
        # whole sequence fits in one tile: block over batch only
        bb = (tile_budget // row_bytes) // 8 * 8
        bb = max(8, min(bb, b_pad8))
        # prefer >= 2 grid steps on the parallel axis (v7x megacore split)
        if bb == b_pad8 and b_pad8 >= 16:
            bb = max(8, (b_pad8 // 2) // 8 * 8)
        tT = T
    else:
        # long sequence: minimal batch block + a T reduction axis
        bb = 8
        tT = max(128, (tile_budget // (8 * D * itemsize)) // 128 * 128)
    return bb, tT


def dot_prod_attention(encoder_output, hidden_state):
    """encoder_output: (B, T, D), hidden_state: (B, D).
    Returns (combo (B, D), energy (B, 1, T)) matching the PyTorch module."""
    B, T, D = encoder_output.shape
    assert hidden_state.shape == (B, D)
    dtype = encoder_output.dtype
    itemsize = jnp.dtype(dtype).itemsize

    bb, tT = _choose_blocks(B, T, D, itemsize)
    Bp = _round_up(B, bb)
    Tp = _round_up(T, tT)

    if Bp != B or Tp != T:
        encoder_output = jnp.pad(
            encoder_output, ((0, Bp - B), (0, Tp - T), (0, 0)))
        hidden_state = jnp.pad(hidden_state, ((0, Bp - B), (0, 0)))

    grid = (Bp // bb, Tp // tT)

    cost = pl.CostEstimate(
        flops=4 * B * T * D,
        transcendentals=0,
        bytes_accessed=itemsize * (B * T * D + 2 * B * D + B * T),
    )

    combo_p, energy_p = pl.pallas_call(
        _dot_prod_attn_kernel,
        out_shape=(
            jax.ShapeDtypeStruct((Bp, D), dtype),    # combo (lane-dense slab)
            jax.ShapeDtypeStruct((Bp, Tp), dtype),   # energy (lane-dense slab)
        ),
        grid_spec=pltpu.PrefetchScalarGridSpec(
            num_scalar_prefetch=0,
            grid=grid,
            in_specs=[
                pl.BlockSpec((bb, tT, D), lambda b, t: (b, t, 0)),  # encoder
                pl.BlockSpec((bb, D), lambda b, t: (b, 0)),          # hidden
            ],
            out_specs=[
                pl.BlockSpec((bb, D), lambda b, t: (b, 0)),          # combo
                pl.BlockSpec((bb, tT), lambda b, t: (b, t)),         # energy
            ],
            scratch_shapes=[pltpu.VMEM((bb, D), jnp.float32)],
        ),
        compiler_params=pltpu.CompilerParams(
            dimension_semantics=("parallel", "arbitrary"),
            vmem_limit_bytes=40 * 1024 * 1024,
        ),
        cost_estimate=cost,
    )(encoder_output, hidden_state)

    combo = combo_p[:B]                                 # (B, D)
    energy = energy_p[:B, :T].reshape(B, 1, T)          # (B, 1, T)
    return combo, energy


def _reference(encoder_output, hidden_state):
    q = hidden_state[:, None, :]                        # (B, 1, D)
    k = jnp.transpose(encoder_output, (0, 2, 1))        # (B, D, T)
    energy = jnp.einsum("bqd,bdt->bqt", q, k)           # (B, 1, T)
    combo = jnp.einsum("bqt,btd->bqd", energy, encoder_output)[:, 0, :]  # (B, D)
    return combo, energy


if __name__ == "__main__":
    # No learned parameters in DotProdAttention (scale/softmax unused in
    # forward), so only the inputs need deterministic construction.
    B, T, D = 2, 8, 32  # batch=2, seq=8, encoder_dim=32
    key = jax.random.PRNGKey(0)
    k1, k2 = jax.random.split(key)
    encoder_output = jax.random.normal(k1, (B, T, D), dtype=jnp.float32)
    hidden_state = jax.random.normal(k2, (B, D), dtype=jnp.float32)

    combo, energy = dot_prod_attention(encoder_output, hidden_state)
    jax.block_until_ready((combo, energy))

    combo_ref, energy_ref = _reference(encoder_output, hidden_state)
    assert combo.shape == (B, D) and energy.shape == (B, 1, T)
    assert jnp.allclose(combo, combo_ref, atol=1e-4, rtol=1e-4)
    assert jnp.allclose(energy, energy_ref, atol=1e-4, rtol=1e-4)

    print("KERNEL_OK")
</pallas_src>

<mosaic_0001>
module attributes {stable_mosaic.version = 11 : i64} {
  func.func @_dot_prod_attn_kernel(%arg0: i32, %arg1: i32, %arg2: memref<8x8x32xf32, #tpu.memory_space<vmem>>, %arg3: memref<8x32xf32, #tpu.memory_space<vmem>>, %arg4: memref<8x32xf32, #tpu.memory_space<vmem>>, %arg5: memref<8x8xf32, #tpu.memory_space<vmem>>, %arg6: memref<8x32xf32, #tpu.memory_space<vmem>>) attributes {dimension_semantics = [#tpu.dimension_semantics<parallel>, #tpu.dimension_semantics<arbitrary>], iteration_bounds = array<i64: 1, 1>, scalar_prefetch = 0 : i64, scratch_operands = 1 : i64, tpu.core_type = #tpu.core_type<tc>, window_params = [{transform_indices = @transform_0, window_bounds = array<i64: 8, 8, 32>}, {transform_indices = @transform_1, window_bounds = array<i64: 8, 32>}, {transform_indices = @transform_2, window_bounds = array<i64: 8, 32>}, {transform_indices = @transform_3, window_bounds = array<i64: 8, 8>}]} {
    %c0 = arith.constant 0 : index
    %c0_0 = arith.constant 0 : index
    %c0_1 = arith.constant 0 : index
    %0 = vector.load %arg2[%c0, %c0_0, %c0_1] : memref<8x8x32xf32, #tpu.memory_space<vmem>>, vector<8x8x32xf32>
    %c0_2 = arith.constant 0 : index
    %c0_3 = arith.constant 0 : index
    %1 = vector.load %arg3[%c0_2, %c0_3] : memref<8x32xf32, #tpu.memory_space<vmem>>, vector<8x32xf32>
    %2 = vector.shape_cast %1 : vector<8x32xf32> to vector<8x1x32xf32>
    %3 = vector.broadcast %2 : vector<8x1x32xf32> to vector<8x8x32xf32>
    %4 = arith.mulf %0, %3 : vector<8x8x32xf32>
    %cst = arith.constant dense<0.000000e+00> : vector<8x8xf32>
    %5 = vector.multi_reduction <add>, %4, %cst [2] : vector<8x8x32xf32> to vector<8x8xf32>
    %c0_4 = arith.constant 0 : index
    %c0_5 = arith.constant 0 : index
    %6 = vector.load %arg5[%c0_4, %c0_5] : memref<8x8xf32, #tpu.memory_space<vmem>>, vector<8x8xf32>
    tpu.vector_store %arg5[%c0_4, %c0_5], %5 {strides = array<i32>} : memref<8x8xf32, #tpu.memory_space<vmem>>, vector<8x8xf32>,
    %7 = vector.shape_cast %5 : vector<8x8xf32> to vector<8x8x1xf32>
    %8 = vector.broadcast %7 : vector<8x8x1xf32> to vector<8x8x32xf32>
    %9 = arith.mulf %0, %8 : vector<8x8x32xf32>
    %cst_6 = arith.constant dense<0.000000e+00> : vector<8x32xf32>
    %10 = vector.multi_reduction <add>, %9, %cst_6 [1] : vector<8x8x32xf32> to vector<8x32xf32>
    %c0_i32 = arith.constant 0 : i32
    %11 = arith.cmpi eq, %arg1, %c0_i32 : i32
    %12 = arith.extui %11 : i1 to i32
    %c0_i32_7 = arith.constant 0 : i32
    %13 = arith.cmpi ne, %12, %c0_i32_7 : i32
    scf.if %13 {
      %cst_14 = arith.constant 0.000000e+00 : f32
      %20 = vector.broadcast %cst_14 : f32 to vector<8x32xf32>
      %c0_15 = arith.constant 0 : index
      %c0_16 = arith.constant 0 : index
      %21 = vector.load %arg6[%c0_15, %c0_16] : memref<8x32xf32, #tpu.memory_space<vmem>>, vector<8x32xf32>
      tpu.vector_store %arg6[%c0_15, %c0_16], %20 {strides = array<i32>} : memref<8x32xf32, #tpu.memory_space<vmem>>, vector<8x32xf32>,
    } else {
    }
    %c0_8 = arith.constant 0 : index
    %c0_9 = arith.constant 0 : index
    %14 = vector.load %arg6[%c0_8, %c0_9] : memref<8x32xf32, #tpu.memory_space<vmem>>, vector<8x32xf32>
    %15 = arith.addf %14, %10 : vector<8x32xf32>
    %c0_10 = arith.constant 0 : index
    %c0_11 = arith.constant 0 : index
    %16 = vector.load %arg6[%c0_10, %c0_11] : memref<8x32xf32, #tpu.memory_space<vmem>>, vector<8x32xf32>
    tpu.vector_store %arg6[%c0_10, %c0_11], %15 {strides = array<i32>} : memref<8x32xf32, #tpu.memory_space<vmem>>, vector<8x32xf32>,
    %c0_i32_12 = arith.constant 0 : i32
    %17 = arith.cmpi eq, %arg1, %c0_i32_12 : i32
    %18 = arith.extui %17 : i1 to i32
    %c0_i32_13 = arith.constant 0 : i32
    %19 = arith.cmpi ne, %18, %c0_i32_13 : i32
    scf.if %19 {
      %c0_14 = arith.constant 0 : index
      %c0_15 = arith.constant 0 : index
      %20 = vector.load %arg6[%c0_14, %c0_15] : memref<8x32xf32, #tpu.memory_space<vmem>>, vector<8x32xf32>
      %c0_16 = arith.constant 0 : index
      %c0_17 = arith.constant 0 : index
      %21 = vector.load %arg4[%c0_16, %c0_17] : memref<8x32xf32, #tpu.memory_space<vmem>>, vector<8x32xf32>
      tpu.vector_store %arg4[%c0_16, %c0_17], %20 {strides = array<i32>} : memref<8x32xf32, #tpu.memory_space<vmem>>, vector<8x32xf32>,
    } else {
    }
    return
  }
  func.func @transform_0(%arg0: i32, %arg1: i32) -> (i32, i32, i32) {
    %c0_i32 = arith.constant 0 : i32
    %c0_i32_0 = arith.constant 0 : i32
    return %arg0, %arg1, %c0_i32 : i32, i32, i32
  }
  func.func @transform_1(%arg0: i32, %arg1: i32) -> (i32, i32) {
    %c0_i32 = arith.constant 0 : i32
    %c0_i32_0 = arith.constant 0 : i32
    return %arg0, %c0_i32 : i32, i32
  }
  func.func @transform_2(%arg0: i32, %arg1: i32) -> (i32, i32) {
    %c0_i32 = arith.constant 0 : i32
    %c0_i32_0 = arith.constant 0 : i32
    return %arg0, %c0_i32 : i32, i32
  }
  func.func @transform_3(%arg0: i32, %arg1: i32) -> (i32, i32) {
    %c0_i32 = arith.constant 0 : i32
    return %arg0, %arg1 : i32, i32
  }
}

</mosaic_0001>

<bundles_post_ra>
// kernel: tpu_custom_call.1
= control target key start
LH: loop header
LB: loop body
LE: loop exit
PB: predicated region body
PF: predicated region fallthrough
CT: control target
= control target key end

     0   :  { %9 = vsyncpa [#allocation4], 0  ;;  %s596_s0 = inlined_call_operand.hbm [shape: f32[8,8,32], index: 0, kind: input, shape index: {}]   ;;  %s597_s1 = inlined_call_operand.hbm [shape: f32[8,32], index: 1, kind: input, shape index: {}]   ;;  %s598_s2 = inlined_call_operand.hbm [shape: f32[8,32], index: 2, kind: output, shape index: {0}]   ;;  %s599_s3 = inlined_call_operand.hbm [shape: f32[8,8], index: 3, kind: output, shape index: {1}]  }
   0x1   :  { %10 = vsyncpa [#allocation7], 0 }
   0x2   :  { %11 = vsyncpa [#allocation5], 0 }
   0x3   :  { %12 = vsyncpa [#allocation10], 0  ;;  %s460_s12 = smov [#allocation3]   ;;  %s364_s16 = scalar_lea.hbm %s596_s0, 1024 }
   0x4   :  { %s18_s13 = sshll.u32 %s460_s12, 4  ;;  %p365_p0 = scmp.ne.s32.totalorder %s596_s0, %s364_s16  ;;  %s19_s13 = int_to_ptr.vmem [resolvable:$true] %s18_s13 }
   0x5   :  { %p368_p1 = scmp.lt.u32.totalorder %s364_s16, %s596_s0 }
   0x7   :  { %p370_p2 = pnand %p368_p1, %p365_p0 }
   0x9   :  { %373 = shalt.err (!%p370_p2)
}
   0xa   :  { %s374_s21 = scalar_lea.vmem %s19_s13, 1024  ;;  %p379_p4 = scmp.lt.s32.totalorder %s19_s13, %s19_s13 }
   0xb   :  { %p375_p3 = scmp.ne.s32.totalorder %s19_s13, %s374_s21  ;;  %p380_p5 = scmp.lt.s32.totalorder %s374_s21, %s374_s21 }
   0xd   :  { %p381_p6 = por %p380_p5, %p379_p4 }
   0xf   :  { %p382_p7 = pnand %p381_p6, %p375_p3 }
  0x11   :  { %385 = shalt.err (!%p382_p7)
}
  0x12   :  { %s461_s22 = smov 128   ;;  %s462_s23 = smov 8  }
  0x13   :  { %24 = dma.hbm_to_vmem [thread:$0]  %s596_s0, 1024, %s19_s13, [#allocation4], %s461_s22, %s461_s22, %s462_s23  }
  0x14   :  { %s463_s26 = smov [#allocation6]   ;;  %s386_s30 = scalar_lea.hbm %s597_s1, 128 }
  0x15   :  { %s31_s27 = sshll.u32 %s463_s26, 4  ;;  %p387_p8 = scmp.ne.s32.totalorder %s597_s1, %s386_s30  ;;  %s32_s27 = int_to_ptr.vmem [resolvable:$true] %s31_s27 }
  0x16   :  { %p390_p9 = scmp.lt.u32.totalorder %s386_s30, %s597_s1 }
  0x18   :  { %p392_p10 = pnand %p390_p9, %p387_p8 }
  0x1a   :  { %395 = shalt.err (!%p392_p10)
}
  0x1b   :  { %s396_s8 = scalar_lea.vmem %s32_s27, 128  ;;  %p401_p12 = scmp.lt.s32.totalorder %s32_s27, %s32_s27 }
  0x1c   :  { %p397_p11 = scmp.ne.s32.totalorder %s32_s27, %s396_s8  ;;  %p402_p13 = scmp.lt.s32.totalorder %s396_s8, %s396_s8 }
  0x1e   :  { %p403_p0 = por %p402_p13, %p401_p12 }
  0x20   :  { %p404_p1 = pnand %p403_p0, %p397_p11 }
  0x22   :  { %407 = shalt.err (!%p404_p1)
}
  0x23   :  { %34 = dma.hbm_to_vmem [thread:$0]  %s597_s1, 128, %s32_s27, [#allocation7]  }
  0x24   :  { %452 = dma.done.wait [#allocation4], 1024  }
  0x25   :  { %453 = vsyncadd [#allocation4], 4294966272 }
  0x26   :  { %454 = dma.done.wait [#allocation7], 128  }
  0x27   :  { %455 = vsyncadd [#allocation7], 4294967168  ;;  %v55_v0 = vlaneseq  ;;  %v464_v1 = vmov 1966171168   ;;  %v49_v8 = vld [vmem:[#allocation6] sm:$0xff]  ;;  %vm148_vm0 = vcmask 261120  }
  0x28   :  { %v53_v2 = vunpack.c.l.s4 %v464_v1  ;;  %v51_v9 = vcombine.high %v49_v8, %v49_v8  ;;  %v41_v15 = vld [vmem:[#allocation3] sm:$0xff]  ;;  %v43_v20 = vld [vmem:[#allocation3 + $0x10] sm:$0xff]  ;;  %v42_v21 = vld [vmem:[#allocation3 + $0x8] sm:$0xff]  ;;  %v465_v55 = vmov 0.0   ;;  %vm215_vm1 = vcmask 1041409   ;;  %s466_s1 = smov [#allocation9]  }
  0x29   :  { %v56_v3 = vshrl.u32 %v55_v0, 7  ;;  %v182_v4 = vand.u32 127, %v55_v0  ;;  %v514_v27 = vld [vmem:[#allocation3 + $0x20] sm:$0xff]  ;;  %v44_v28 = vld [vmem:[#allocation3 + $0x18] sm:$0xff]  ;;  %v518_v37 = vld [vmem:[#allocation3 + $0x28] sm:$0xff]  ;;  %300 = vst.msk [vmem:[#allocation2] sm:$0xff] %vm148_vm0, %v465_v55 }
  0x2a   :  { %v54_v5 = vunpack.c.0.s8 %v53_v2  ;;  %v522_v44 = vld [vmem:[#allocation3 + $0x30] sm:$0xff]  ;;  %v526_v48 = vld [vmem:[#allocation3 + $0x38] sm:$0xff]  ;;  %vm217_vm2 = vcmask 1042434   ;;  %vm219_vm3 = vcmask 1043459   ;;  %vm221_vm4 = vcmask 1044484   ;;  %s341_s10 = sshll.u32 %s466_s1, 4  ;;  %s342_s10 = int_to_ptr.vmem [resolvable:$true] %s341_s10 }
  0x2b   :  { %v512_v6 = vsub.s32 %v182_v4, %v56_v3  ;;  %v102_v11 = vsub.s32 0, %v56_v3  ;;  %vm223_vm5 = vcmask 1045509   ;;  %vm225_vm6 = vcmask 1046534   ;;  %s408_s11 = scalar_lea.vmem %s342_s10, 128  ;;  %p413_p3 = scmp.lt.s32.totalorder %s342_s10, %s342_s10 }
  0x2c   :  { %v57_v7 = vsub.s32 %v54_v5, %v56_v3  ;;  %vm227_vm7 = vcmask 1047559   ;;  %vm230_vm8 = vcmask 64512   ;;  %p409_p2 = scmp.ne.s32.totalorder %s342_s10, %s408_s11  ;;  %p414_p4 = scmp.lt.s32.totalorder %s408_s11, %s408_s11 }
  0x2e   :  { %v58_v10 = vrot.slane %v49_v8, %v57_v7  ;;  %v65_v14 = vrot.slane %v51_v9, %v57_v7  ;;  %p415_p5 = por %p414_p4, %p413_p3 }
  0x30   :  { %v74_v12 = vrot.slane %v58_v10, %v57_v7  ;;  %v66_v13 = vcombine.high %v58_v10, %v58_v10  ;;  %v81_v19 = vrot.slane %v65_v14, %v57_v7  ;;  %v67_v22 = vcombine.high %v65_v14, %v65_v14  ;;  %p416_p6 = pnand %p415_p5, %p409_p2 }
  0x32   :  { %v103_v16 = vrot.slane %v74_v12, %v102_v11  ;;  %v96_v17 = vcombine.high %v74_v12, %v74_v12  ;;  %v88_v18 = vrot.slane %v66_v13, %v57_v7  ;;  %v119_v29 = vrot.slane %v81_v19, %v102_v11 }
  0x33   :  { %v95_v30 = vrot.slane %v67_v22, %v57_v7  ;;  %v97_v31 = vcombine.high %v81_v19, %v81_v19 }
  0x34   :  { %v140_v23 = vmul.f32 %v103_v16, %v41_v15  ;;  %v111_v24 = vrot.slane %v96_v17, %v102_v11  ;;  %v107_v25 = vrot.slane %v88_v18, %v102_v11  ;;  %v98_v26 = vcombine.high %v88_v18, %v88_v18 }
  0x35   :  { %v144_v36 = vmul.f32 %v119_v29, %v514_v27  ;;  %v123_v38 = vrot.slane %v95_v30, %v102_v11  ;;  %v99_v39 = vcombine.high %v95_v30, %v95_v30  ;;  %v127_v43 = vrot.slane %v97_v31, %v102_v11 }
  0x36   :  { %v149_v32 = vsel %vm148_vm0, %v140_v23, 0.0  ;;  %v142_v33 = vmul.f32 %v111_v24, %v43_v20  ;;  %v141_v34 = vmul.f32 %v107_v25, %v42_v21  ;;  %v115_v35 = vrot.slane %v98_v26, %v102_v11 }
  0x37   :  { %150 = vadd.xlane.f32.xlu0 %v149_v32  ;;  %v145_v46 = vmul.f32 %v123_v38, %v518_v37  ;;  %v131_v47 = vrot.slane %v99_v39, %v102_v11  ;;  %v161_v49 = vsel %vm148_vm0, %v144_v36, 0.0  ;;  %v146_v50 = vmul.f32 %v127_v43, %v522_v44 }
  0x38   :  { %v155_v40 = vsel %vm148_vm0, %v142_v33, 0.0  ;;  %v152_v41 = vsel %vm148_vm0, %v141_v34, 0.0  ;;  %v143_v42 = vmul.f32 %v115_v35, %v44_v28 }
  0x39   :  { %156 = vadd.xlane.f32.xlu1 %v155_v40  ;;  %v164_v51 = vsel %vm148_vm0, %v145_v46, 0.0  ;;  %v147_v52 = vmul.f32 %v131_v47, %v526_v48  ;;  %v167_v53 = vsel %vm148_vm0, %v146_v50, 0.0 }
  0x3a   :  { %v158_v45 = vsel %vm148_vm0, %v143_v42, 0.0 }
  0x3b   :  { %153 = vadd.xlane.f32.xlu0 %v152_v41  ;;  %v170_v54 = vsel %vm148_vm0, %v147_v52, 0.0 }
  0x3d   :  { %159 = vadd.xlane.f32.xlu1 %v158_v45 }
  0x3f   :  { %162 = vadd.xlane.f32.xlu0 %v161_v49 }
  0x41   :  { %165 = vadd.xlane.f32.xlu1 %v164_v51 }
  0x43   :  { %168 = vadd.xlane.f32.xlu0 %v167_v53 }
  0x45   :  { %171 = vadd.xlane.f32.xlu1 %v170_v54 }
  0xc4   :  { %v151_v56 = vpop.xlane.xlu0 %150 }
  0xc5   :  { %v232_v57 = vmul.f32 %v151_v56, %v41_v15  ;;  %v186_v63 = vrot.slane %v151_v56, %v512_v6 }
  0xc6   :  { %v157_v58 = vpop.xlane.xlu1 %156 }
  0xc7   :  { %v240_v59 = vsel %vm148_vm0, %v232_v57, 0.0  ;;  %v234_v60 = vmul.f32 %v157_v58, %v43_v20  ;;  %v194_v4 = vrot.slane %v157_v58, %v512_v6 }
  0xc8   :  { %v241_v61 = vrot.slane %v240_v59, 4  ;;  %v154_v62 = vpop.xlane.xlu0 %153 }
  0xc9   :  { %v254_v0 = vsel %vm148_vm0, %v234_v60, 0.0  ;;  %v190_v1 = vrot.slane %v154_v62, %v512_v6  ;;  %v233_v2 = vmul.f32 %v154_v62, %v42_v21 }
  0xca   :  { %v242_v3 = vadd.f32 %v241_v61, %v240_v59  ;;  %v255_v5 = vrot.slane %v254_v0, 4  ;;  %v160_v7 = vpop.xlane.xlu1 %159 }
  0xcb   :  { %v216_v8 = vsel %vm215_vm1, %v190_v1, %v186_v63  ;;  %v247_v9 = vsel %vm148_vm0, %v233_v2, 0.0  ;;  %v198_v10 = vrot.slane %v160_v7, %v512_v6  ;;  %v235_v11 = vmul.f32 %v160_v7, %v44_v28 }
  0xcc   :  { %v243_v12 = vrot.slane %v242_v3, 2  ;;  %v256_v13 = vadd.f32 %v255_v5, %v254_v0  ;;  %v248_v14 = vrot.slane %v247_v9, 4  ;;  %v218_v15 = vsel %vm217_vm2, %v194_v4, %v216_v8  ;;  %v163_v16 = vpop.xlane.xlu0 %162 }
  0xcd   :  { %v220_v17 = vsel %vm219_vm3, %v198_v10, %v218_v15  ;;  %v261_v18 = vsel %vm148_vm0, %v235_v11, 0.0  ;;  %v202_v19 = vrot.slane %v163_v16, %v512_v6  ;;  %v236_v20 = vmul.f32 %v163_v16, %v514_v27 }
  0xce   :  { %v244_v21 = vadd.f32 %v243_v12, %v242_v3  ;;  %v257_v22 = vrot.slane %v256_v13, 2  ;;  %v249_v23 = vadd.f32 %v248_v14, %v247_v9  ;;  %v262_v24 = vrot.slane %v261_v18, 4  ;;  %v166_v25 = vpop.xlane.xlu1 %165 }
  0xcf   :  { %v222_v26 = vsel %vm221_vm4, %v202_v19, %v220_v17  ;;  %v268_v28 = vsel %vm148_vm0, %v236_v20, 0.0  ;;  %v206_v29 = vrot.slane %v166_v25, %v512_v6  ;;  %v237_v30 = vmul.f32 %v166_v25, %v518_v37 }
  0xd0   :  { %v245_v31 = vrot.slane %v244_v21, 1  ;;  %v258_v32 = vadd.f32 %v257_v22, %v256_v13  ;;  %v250_v33 = vrot.slane %v249_v23, 2  ;;  %v263_v34 = vadd.f32 %v262_v24, %v261_v18  ;;  %v169_v35 = vpop.xlane.xlu0 %168 }
  0xd1   :  { %v269_v36 = vrot.slane %v268_v28, 4  ;;  %v224_v27 = vsel %vm223_vm5, %v206_v29, %v222_v26  ;;  %v275_v38 = vsel %vm148_vm0, %v237_v30, 0.0  ;;  %v210_v39 = vrot.slane %v169_v35, %v512_v6 }
  0xd2   :  { %v259_v40 = vrot.slane %v258_v32, 1  ;;  %v251_v41 = vadd.f32 %v250_v33, %v249_v23  ;;  %v264_v42 = vrot.slane %v263_v34, 2  ;;  %v172_v43 = vpop.xlane.xlu1 %171  ;;  %v276_v45 = vrot.slane %v275_v38, 4 }
  0xd3   :  { %v270_v37 = vadd.f32 %v269_v36, %v268_v28  ;;  %v226_v46 = vsel %vm225_vm6, %v210_v39, %v224_v27  ;;  %v238_v47 = vmul.f32 %v169_v35, %v522_v44  ;;  %v246_v49 = vadd.f32 %v245_v31, %v244_v21 }
  0xd4   :  { %v252_v50 = vrot.slane %v251_v41, 1  ;;  %v265_v51 = vadd.f32 %v264_v42, %v263_v34  ;;  %v214_v52 = vrot.slane %v172_v43, %v512_v6  ;;  %v277_v54 = vadd.f32 %v276_v45, %v275_v38 }
  0xd5   :  { %v271_v53 = vrot.slane %v270_v37, 2  ;;  %v282_v55 = vsel %vm148_vm0, %v238_v47, 0.0  ;;  %v239_v56 = vmul.f32 %v172_v43, %v526_v48  ;;  %v260_v61 = vadd.f32 %v259_v40, %v258_v32 }
  0xd6   :  { %v253_v57 = vadd.f32 %v252_v50, %v251_v41  ;;  %v266_v58 = vrot.slane %v265_v51, 1  ;;  %v283_v59 = vrot.slane %v282_v55, 4  ;;  %v228_v60 = vsel %vm227_vm7, %v214_v52, %v226_v46 }
  0xd7   :  { %v272_v62 = vadd.f32 %v271_v53, %v270_v37  ;;  %v278_v44 = vrot.slane %v277_v54, 2  ;;  %v289_v63 = vsel %vm148_vm0, %v239_v56, 0.0  ;;  %231 = vst.msk [vmem:[#allocation9] sm:$0xff] %vm230_vm8, %v228_v60 }
  0xd8   :  { %v310_v6 = vsel %vm215_vm1, %v253_v57, %v246_v49  ;;  %v267_v0 = vadd.f32 %v266_v58, %v265_v51  ;;  %v284_v1 = vadd.f32 %v283_v59, %v282_v55  ;;  %v290_v2 = vrot.slane %v289_v63, 4 }
  0xd9   :  { %419 = shalt.err (!%p416_p6)
}
  0xda   :  { %s420_s14 = scalar_lea.hbm %s599_s3, 128 }
  0xdb   :  { %p421_p7 = scmp.ne.s32.totalorder %s599_s3, %s420_s14  ;;  %p424_p8 = scmp.lt.u32.totalorder %s420_s14, %s599_s3 }
  0xdd   :  { %p426_p9 = pnand %p424_p8, %p421_p7 }
  0xdf   :  { %429 = shalt.err (!%p426_p9)
}
  0xe0   :  { %344 = dma.vmem_to_hbm [thread:$0]  %s342_s10, 128, %s599_s3, [#allocation10]   ;;  %v311_v48 = vsel %vm217_vm2, %v260_v61, %v310_v6  ;;  %v273_v3 = vrot.slane %v272_v62, 1  ;;  %v279_v4 = vadd.f32 %v278_v44, %v277_v54  ;;  %v285_v7 = vrot.slane %v284_v1, 2  ;;  %v301_v21 = vld [vmem:[#allocation2] sm:$0xff] }
  0xe1   :  { %v312_v5 = vsel %vm219_vm3, %v267_v0, %v311_v48  ;;  %v291_v8 = vadd.f32 %v290_v2, %v289_v63  ;;  %s467_s3 = smov [#allocation8]  }
  0xe2   :  { %v274_v9 = vadd.f32 %v273_v3, %v272_v62  ;;  %v280_v10 = vrot.slane %v279_v4, 1  ;;  %v286_v11 = vadd.f32 %v285_v7, %v284_v1  ;;  %s331_s21 = sshll.u32 %s467_s3, 4  ;;  %s332_s21 = int_to_ptr.vmem [resolvable:$true] %s331_s21 }
  0xe3   :  { %v292_v12 = vrot.slane %v291_v8, 2  ;;  %s430_s22 = scalar_lea.vmem %s332_s21, 128  ;;  %p435_p11 = scmp.lt.s32.totalorder %s332_s21, %s332_s21 }
  0xe4   :  { %v313_v13 = vsel %vm221_vm4, %v274_v9, %v312_v5  ;;  %v281_v14 = vadd.f32 %v280_v10, %v279_v4  ;;  %v287_v15 = vrot.slane %v286_v11, 1  ;;  %p431_p10 = scmp.ne.s32.totalorder %s332_s21, %s430_s22  ;;  %p436_p12 = scmp.lt.s32.totalorder %s430_s22, %s430_s22 }
  0xe5   :  { %v293_v16 = vadd.f32 %v292_v12, %v291_v8 }
  0xe6   :  { %v314_v17 = vsel %vm223_vm5, %v281_v14, %v313_v13  ;;  %v288_v18 = vadd.f32 %v287_v15, %v286_v11  ;;  %p437_p13 = por %p436_p12, %p435_p11 }
  0xe7   :  { %v294_v19 = vrot.slane %v293_v16, 1 }
  0xe8   :  { %v315_v20 = vsel %vm225_vm6, %v288_v18, %v314_v17  ;;  %p438_p0 = pnand %p437_p13, %p431_p10 }
  0xe9   :  { %v295_v22 = vadd.f32 %v294_v19, %v293_v16 }
  0xeb   :  { %v316_v23 = vsel %vm227_vm7, %v295_v22, %v315_v20 }
  0xec   :  { %v318_v24 = vadd.f32 %v316_v23, %v301_v21 }
  0xee   :  { %319 = vst.msk [vmem:[#allocation2] sm:$0xff] %vm148_vm0, %v318_v24 }
  0xf5   :  { %v323_v25 = vld [vmem:[#allocation2] sm:$0xff] }
  0xf6   :  { %324 = vst.msk [vmem:[#allocation8] sm:$0xff] %vm148_vm0, %v323_v25 }
  0xf7   :  { %441 = shalt.err (!%p438_p0)
}
  0xf8   :  { %s442_s25 = scalar_lea.hbm %s598_s2, 128 }
  0xf9   :  { %p443_p1 = scmp.ne.s32.totalorder %s598_s2, %s442_s25  ;;  %p446_p2 = scmp.lt.u32.totalorder %s442_s25, %s598_s2 }
  0xfb   :  { %p448_p3 = pnand %p446_p2, %p443_p1 }
  0xfd   :  { %451 = shalt.err (!%p448_p3)
}
  0xfe   :  { %334 = dma.vmem_to_hbm [thread:$0]  %s332_s21, 128, %s598_s2, [#allocation5]  }
  0xff   :  { %456 = dma.done.wait [#allocation5], 128  }
 0x100   :  { %457 = vsyncadd [#allocation5], 4294967168 }
 0x101   :  { %458 = dma.done.wait [#allocation10], 128  }
 0x102   :  { %459 = vsyncadd [#allocation10], 4294967168 }
 0x103   :  { %351 = vsyncpa [#allocation4], 1 }
 0x104   :  { %352 = vsyncpa [#allocation7], 1 }
 0x105   :  { %353 = vsyncpa [#allocation5], 1 }
 0x106   :  { %354 = vsyncpa [#allocation10], 1 }

</bundles_post_ra>
